<compile_context>
chip_gen: v6e
topology: v6e:2x2x1
jax: 0.10.0
libtpu: 0.0.40
codegen_flags: <defaults>
</compile_context>

<pallas_src>
import functools

import jax
import jax.numpy as jnp
import numpy as np
from jax import lax
from jax.experimental import pallas as pl
from jax.experimental.pallas import tpu as pltpu


def _round_up(x, m):
    return ((x + m - 1) // m) * m


def _embeddings_kernel(wid_ref,        # SMEM (scalar prefetch): (n_pad,) int32 word ids
                       word_hbm,       # ANY/HBM: (vocab, H) word embedding table
                       pid_ref,        # VMEM: (T, 1) int32 position ids of this block
                       tid_ref,        # VMEM: (T, 1) int32 token-type ids of this block
                       pos_ref,        # VMEM: (max_pos, H) resident position table
                       type_ref,       # VMEM: (n_types, H) resident token-type table
                       gamma_ref,      # VMEM: (1, H) f32
                       beta_ref,       # VMEM: (1, H) f32
                       out_ref,        # VMEM: (T, H) output block
                       gather_buf,     # scratch VMEM: (T, H) gathered word rows
                       dma_sem,        # scratch: DMA semaphore array (1,)
                       *, eps):
    T, H = out_ref.shape
    blk = pl.program_id(0)
    base = blk * T

    def row_copy(row, t):
        return pltpu.make_async_copy(
            word_hbm.at[pl.ds(row, 1), :],
            gather_buf.at[pl.ds(t, 1), :],
            dma_sem.at[0])

    # 1) Issue all T word-row gathers; they stay in flight while we compute
    #    the position / token-type contributions below.
    def issue(t, carry):
        row = wid_ref[base + t]
        row_copy(row, t).start()
        return carry
    lax.fori_loop(0, T, issue, 0)

    # 2) Position rows: one_hot(position_ids) @ pos_table on the MXU.
    max_pos = pos_ref.shape[0]
    pids = pid_ref[...]                                              # (T, 1) int32
    pos_oh = (pids == lax.broadcasted_iota(jnp.int32, (T, max_pos), 1)
              ).astype(jnp.float32)                                  # (T, max_pos)
    pos_rows = jnp.dot(pos_oh, pos_ref[...].astype(jnp.float32),
                       preferred_element_type=jnp.float32)           # (T, H)

    # 3) Token-type rows: tiny table (2 rows for BERT) -> VPU select/accumulate.
    tids = tid_ref[...]                                              # (T, 1) int32
    type_tab = type_ref[...].astype(jnp.float32)                     # (n_types, H)
    type_rows = jnp.zeros((T, H), jnp.float32)
    for k in range(type_ref.shape[0]):                               # static, small
        sel = (tids == k).astype(jnp.float32)                        # (T, 1)
        type_rows = type_rows + sel * type_tab[k:k + 1, :]

    # 4) Wait for this block's word-row gathers to land.
    def drain(t, carry):
        row_copy(0, t).wait()
        return carry
    lax.fori_loop(0, T, drain, 0)

    # 5) Sum + LayerNorm (biased variance, like torch LayerNorm).
    x = gather_buf[...].astype(jnp.float32) + pos_rows + type_rows
    mean = jnp.mean(x, axis=-1, keepdims=True)
    var = jnp.mean((x - mean) ** 2, axis=-1, keepdims=True)
    y = (x - mean) * lax.rsqrt(var + eps)
    y = y * gamma_ref[...] + beta_ref[...]
    out_ref[...] = y.astype(out_ref.dtype)


def bert_embeddings(input_ids, token_type_ids, position_ids,
                    word_emb, pos_emb, type_emb, gamma, beta,
                    *, eps=1e-12, block_tokens=128):
    """Pallas implementation of BertEmbeddings.forward (eval mode).

    input_ids / token_type_ids / position_ids : (B, S) int32
    word_emb : (vocab, H), pos_emb : (max_pos, H), type_emb : (n_types, H)
    gamma, beta : (H,)
    returns (B, S, H) float32
    """
    B, S = input_ids.shape
    H = word_emb.shape[1]
    n = B * S

    # Token block size: multiple of 8 (sublane), capped by block_tokens.
    T = min(block_tokens, _round_up(n, 8))
    n_pad = _round_up(n, T)
    nblk = n_pad // T

    def flat_pad(ids):
        flat = ids.reshape(n).astype(jnp.int32)
        return jnp.pad(flat, (0, n_pad - n))          # pad with id 0 (valid row)

    wid = flat_pad(input_ids)                          # (n_pad,)  -> SMEM
    pid2 = flat_pad(position_ids).reshape(n_pad, 1)    # (n_pad,1) -> VMEM blocks
    tid2 = flat_pad(token_type_ids).reshape(n_pad, 1)
    gamma2 = gamma.reshape(1, H).astype(jnp.float32)
    beta2 = beta.reshape(1, H).astype(jnp.float32)

    max_pos = pos_emb.shape[0]
    n_types = type_emb.shape[0]

    grid_spec = pltpu.PrefetchScalarGridSpec(
        num_scalar_prefetch=1,                          # word ids -> SMEM
        grid=(nblk,),
        in_specs=[
            pl.BlockSpec(memory_space=pl.ANY),                   # word table (HBM)
            pl.BlockSpec((T, 1), lambda i, ids: (i, 0)),         # position ids
            pl.BlockSpec((T, 1), lambda i, ids: (i, 0)),         # token-type ids
            pl.BlockSpec((max_pos, H), lambda i, ids: (0, 0)),   # pos table (resident)
            pl.BlockSpec((n_types, H), lambda i, ids: (0, 0)),   # type table (resident)
            pl.BlockSpec((1, H), lambda i, ids: (0, 0)),         # gamma
            pl.BlockSpec((1, H), lambda i, ids: (0, 0)),         # beta
        ],
        out_specs=pl.BlockSpec((T, H), lambda i, ids: (i, 0)),
        scratch_shapes=[
            pltpu.VMEM((T, H), word_emb.dtype),        # gathered word rows
            pltpu.SemaphoreType.DMA((1,)),             # shared gather semaphore
        ],
    )

    out_flat = pl.pallas_call(
        functools.partial(_embeddings_kernel, eps=eps),
        out_shape=jax.ShapeDtypeStruct((n_pad, H), jnp.float32),
        grid_spec=grid_spec,
        compiler_params=pltpu.CompilerParams(
            dimension_semantics=("parallel",),          # tokens are independent
            vmem_limit_bytes=32 * 1024 * 1024,
        ),
    )(wid, word_emb, pid2, tid2, pos_emb, type_emb, gamma2, beta2)

    return out_flat[:n].reshape(B, S, H)


def _reference(input_ids, token_type_ids, position_ids,
               word_emb, pos_emb, type_emb, gamma, beta, eps):
    x = (word_emb[input_ids]
         + pos_emb[position_ids]
         + type_emb[token_type_ids]).astype(jnp.float32)
    mean = jnp.mean(x, axis=-1, keepdims=True)
    var = jnp.mean((x - mean) ** 2, axis=-1, keepdims=True)
    return (x - mean) / jnp.sqrt(var + eps) * gamma + beta


if __name__ == "__main__":
    # Synthetic "config" consistent with the module. vocab_size > 1027 so the
    # padding_idx=1027 of nn.Embedding is a valid (zero-initialized) row.
    vocab_size = 1536
    hidden_size = 32
    max_position_embeddings = 64
    type_vocab_size = 2
    layer_norm_eps = 1e-12
    padding_idx = 1027

    B, S = 2, 8

    key = jax.random.PRNGKey(0)
    k_w, k_p, k_t, k_ids = jax.random.split(key, 4)

    # Deterministic parameter init (BERT-style N(0, 0.02)); padding row zeroed.
    word_emb = 0.02 * jax.random.normal(k_w, (vocab_size, hidden_size), jnp.float32)
    word_emb = word_emb.at[padding_idx].set(0.0)
    pos_emb = 0.02 * jax.random.normal(k_p, (max_position_embeddings, hidden_size),
                                       jnp.float32)
    type_emb = 0.02 * jax.random.normal(k_t, (type_vocab_size, hidden_size),
                                        jnp.float32)
    gamma = jnp.ones((hidden_size,), jnp.float32)
    beta = jnp.zeros((hidden_size,), jnp.float32)

    # "inputs_embeds" in the PyTorch module is actually a tensor of token ids.
    input_ids = jax.random.randint(k_ids, (B, S), 0, vocab_size, dtype=jnp.int32)
    input_ids = input_ids.at[0, 0].set(padding_idx)  # exercise the padding row

    # Defaults from the forward pass: position_ids = arange(S) broadcast,
    # token_type_ids = zeros.
    position_ids = jnp.broadcast_to(jnp.arange(S, dtype=jnp.int32), (B, S))
    token_type_ids = jnp.zeros((B, S), dtype=jnp.int32)

    out = bert_embeddings(input_ids, token_type_ids, position_ids,
                          word_emb, pos_emb, type_emb, gamma, beta,
                          eps=layer_norm_eps)
    out = jax.block_until_ready(out)

    ref = _reference(input_ids, token_type_ids, position_ids,
                     word_emb, pos_emb, type_emb, gamma, beta, layer_norm_eps)
    np.testing.assert_allclose(np.asarray(out), np.asarray(ref),
                               rtol=1e-5, atol=1e-5)

    print("KERNEL_OK")
</pallas_src>

<mosaic_0001>
module attributes {stable_mosaic.version = 11 : i64} {
  func.func @_embeddings_kernel(%arg0: i32, %arg1: memref<16xi32, #tpu.memory_space<smem>>, %arg2: memref<1536x32xf32, #tpu.memory_space<any>>, %arg3: memref<16x1xi32, #tpu.memory_space<vmem>>, %arg4: memref<16x1xi32, #tpu.memory_space<vmem>>, %arg5: memref<64x32xf32, #tpu.memory_space<vmem>>, %arg6: memref<2x32xf32, #tpu.memory_space<vmem>>, %arg7: memref<1x32xf32, #tpu.memory_space<vmem>>, %arg8: memref<1x32xf32, #tpu.memory_space<vmem>>, %arg9: memref<16x32xf32, #tpu.memory_space<vmem>>, %arg10: memref<16x32xf32, #tpu.memory_space<vmem>>, %arg11: memref<1x!tpu.dma_semaphore, #tpu.memory_space<semaphore_mem>>) attributes {dimension_semantics = [#tpu.dimension_semantics<parallel>], iteration_bounds = array<i64: 1>, scalar_prefetch = 1 : i64, scratch_operands = 2 : i64, tpu.core_type = #tpu.core_type<tc>, window_params = [{}, {transform_indices = @transform_1, window_bounds = array<i64: 16, 1>}, {transform_indices = @transform_2, window_bounds = array<i64: 16, 1>}, {pipeline_mode = #tpu.pipeline_mode<synchronous>, transform_indices = @transform_3, window_bounds = array<i64: 64, 32>}, {pipeline_mode = #tpu.pipeline_mode<synchronous>, transform_indices = @transform_4, window_bounds = array<i64: 2, 32>}, {pipeline_mode = #tpu.pipeline_mode<synchronous>, transform_indices = @transform_5, window_bounds = array<i64: 1, 32>}, {pipeline_mode = #tpu.pipeline_mode<synchronous>, transform_indices = @transform_6, window_bounds = array<i64: 1, 32>}, {transform_indices = @transform_7, window_bounds = array<i64: 16, 32>}]} {
    %c16_i32 = arith.constant 16 : i32
    %0 = arith.muli %arg0, %c16_i32 : i32
    %c0_i32 = arith.constant 0 : i32
    %c16_i32_0 = arith.constant 16 : i32
    %1 = arith.addi %c0_i32, %c16_i32_0 : i32
    %c1_i32 = arith.constant 1 : i32
    scf.for %arg12 = %c0_i32 to %1 step %c1_i32  : i32 {
      %60 = arith.addi %0, %arg12 : i32
      %61 = arith.index_cast %60 : i32 to index
      %62 = memref.load %arg1[%61] : memref<16xi32, #tpu.memory_space<smem>>
      %c0_i32_29 = arith.constant 0 : i32
      %c0_i32_30 = arith.constant 0 : i32
      %63 = tpu.memref_slice %arg2[%62, %c0_i32_30] : memref<1536x32xf32, #tpu.memory_space<any>> -> memref<1x32xf32, #tpu.memory_space<any>>
      %c0_i32_31 = arith.constant 0 : i32
      %64 = tpu.memref_slice %arg10[%arg12, %c0_i32_31] : memref<16x32xf32, #tpu.memory_space<vmem>> -> memref<1x32xf32, #tpu.memory_space<vmem>>
      %65 = tpu.memref_slice %arg11[%c0_i32_29] : memref<1x!tpu.dma_semaphore, #tpu.memory_space<semaphore_mem>> -> memref<1x!tpu.dma_semaphore, #tpu.memory_space<semaphore_mem>>
      %66 = tpu.memref_squeeze %65 : memref<1x!tpu.dma_semaphore, #tpu.memory_space<semaphore_mem>> -> memref<!tpu.dma_semaphore, #tpu.memory_space<semaphore_mem>>
      tpu.enqueue_dma source(%63 : memref<1x32xf32, #tpu.memory_space<any>>) target(%64 : memref<1x32xf32, #tpu.memory_space<vmem>>) target_semaphore(%66 : memref<!tpu.dma_semaphore, #tpu.memory_space<semaphore_mem>>)
    }
    %c16_i32_1 = arith.constant 16 : i32
    %c0 = arith.constant 0 : index
    %c0_2 = arith.constant 0 : index
    %2 = vector.load %arg3[%c0, %c0_2] : memref<16x1xi32, #tpu.memory_space<vmem>>, vector<16x1xi32>
    %3 = tpu.iota {dimensions = array<i32: 1>} : vector<16x64xi32>
    %4 = vector.broadcast %2 : vector<16x1xi32> to vector<16x64xi32>
    %5 = arith.cmpi eq, %4, %3 : vector<16x64xi32>
    %6 = arith.extui %5 : vector<16x64xi1> to vector<16x64xi32>
    %7 = arith.sitofp %6 : vector<16x64xi32> to vector<16x64xf32>
    %c0_3 = arith.constant 0 : index
    %c0_4 = arith.constant 0 : index
    %8 = vector.load %arg5[%c0_3, %c0_4] : memref<64x32xf32, #tpu.memory_space<vmem>>, vector<64x32xf32>
    %cst = arith.constant dense<0.000000e+00> : vector<16x32xf32>
    %9 = tpu.matmul %7, %8, %cst {dimension_numbers = #tpu.dot_dimension_numbers<[1], [0], [0], [1], [0, 0, 1, 1], [], []>} : vector<16x64xf32>, vector<64x32xf32>, vector<16x32xf32> -> vector<16x32xf32>
    %c0_5 = arith.constant 0 : index
    %c0_6 = arith.constant 0 : index
    %10 = vector.load %arg4[%c0_5, %c0_6] : memref<16x1xi32, #tpu.memory_space<vmem>>, vector<16x1xi32>
    %c0_7 = arith.constant 0 : index
    %c0_8 = arith.constant 0 : index
    %11 = vector.load %arg6[%c0_7, %c0_8] : memref<2x32xf32, #tpu.memory_space<vmem>>, vector<2x32xf32>
    %cst_9 = arith.constant 0.000000e+00 : f32
    %12 = vector.broadcast %cst_9 : f32 to vector<16x32xf32>
    %c0_i32_10 = arith.constant 0 : i32
    %13 = vector.broadcast %c0_i32_10 : i32 to vector<16x1xi32>
    %14 = arith.cmpi eq, %10, %13 : vector<16x1xi32>
    %15 = arith.extui %14 : vector<16x1xi1> to vector<16x1xi32>
    %16 = arith.sitofp %15 : vector<16x1xi32> to vector<16x1xf32>
    %17 = vector.extract_strided_slice %11 {offsets = [0, 0], sizes = [1, 32], strides = [1, 1]} : vector<2x32xf32> to vector<1x32xf32>
    %18 = vector.broadcast %16 : vector<16x1xf32> to vector<16x32xf32>
    %19 = vector.broadcast %17 : vector<1x32xf32> to vector<16x32xf32>
    %20 = arith.mulf %18, %19 : vector<16x32xf32>
    %21 = arith.addf %12, %20 : vector<16x32xf32>
    %c1_i32_11 = arith.constant 1 : i32
    %22 = vector.broadcast %c1_i32_11 : i32 to vector<16x1xi32>
    %23 = arith.cmpi eq, %10, %22 : vector<16x1xi32>
    %24 = arith.extui %23 : vector<16x1xi1> to vector<16x1xi32>
    %25 = arith.sitofp %24 : vector<16x1xi32> to vector<16x1xf32>
    %26 = vector.extract_strided_slice %11 {offsets = [1, 0], sizes = [1, 32], strides = [1, 1]} : vector<2x32xf32> to vector<1x32xf32>
    %27 = vector.broadcast %25 : vector<16x1xf32> to vector<16x32xf32>
    %28 = vector.broadcast %26 : vector<1x32xf32> to vector<16x32xf32>
    %29 = arith.mulf %27, %28 : vector<16x32xf32>
    %30 = arith.addf %21, %29 : vector<16x32xf32>
    %c0_i32_12 = arith.constant 0 : i32
    %c16_i32_13 = arith.constant 16 : i32
    %31 = arith.addi %c0_i32_12, %c16_i32_13 : i32
    %c1_i32_14 = arith.constant 1 : i32
    scf.for %arg12 = %c0_i32_12 to %31 step %c1_i32_14  : i32 {
      %c0_i32_29 = arith.constant 0 : i32
      %c0_i32_30 = arith.constant 0 : i32
      %c0_i32_31 = arith.constant 0 : i32
      %60 = tpu.memref_slice %arg2[%c0_i32_30, %c0_i32_31] : memref<1536x32xf32, #tpu.memory_space<any>> -> memref<1x32xf32, #tpu.memory_space<any>>
      %c0_i32_32 = arith.constant 0 : i32
      %61 = tpu.memref_slice %arg10[%arg12, %c0_i32_32] : memref<16x32xf32, #tpu.memory_space<vmem>> -> memref<1x32xf32, #tpu.memory_space<vmem>>
      %62 = tpu.memref_slice %arg11[%c0_i32_29] : memref<1x!tpu.dma_semaphore, #tpu.memory_space<semaphore_mem>> -> memref<1x!tpu.dma_semaphore, #tpu.memory_space<semaphore_mem>>
      %63 = tpu.memref_squeeze %62 : memref<1x!tpu.dma_semaphore, #tpu.memory_space<semaphore_mem>> -> memref<!tpu.dma_semaphore, #tpu.memory_space<semaphore_mem>>
      tpu.wait_dma2 semaphore(%63 : memref<!tpu.dma_semaphore, #tpu.memory_space<semaphore_mem>>) src(%60 : memref<1x32xf32, #tpu.memory_space<any>>) dst(%61 : memref<1x32xf32, #tpu.memory_space<vmem>>)
    }
    %c16_i32_15 = arith.constant 16 : i32
    %c0_16 = arith.constant 0 : index
    %c0_17 = arith.constant 0 : index
    %32 = vector.load %arg10[%c0_16, %c0_17] : memref<16x32xf32, #tpu.memory_space<vmem>>, vector<16x32xf32>
    %33 = arith.addf %32, %9 : vector<16x32xf32>
    %34 = arith.addf %33, %30 : vector<16x32xf32>
    %cst_18 = arith.constant dense<0.000000e+00> : vector<16xf32>
    %35 = vector.multi_reduction <add>, %34, %cst_18 [1] : vector<16x32xf32> to vector<16xf32>
    %36 = vector.shape_cast %35 : vector<16xf32> to vector<16x1xf32>
    %cst_19 = arith.constant 3.200000e+01 : f32
    %37 = vector.broadcast %cst_19 : f32 to vector<16x1xf32>
    %38 = arith.divf %36, %37 : vector<16x1xf32>
    %39 = vector.broadcast %38 : vector<16x1xf32> to vector<16x32xf32>
    %40 = arith.subf %34, %39 : vector<16x32xf32>
    %41 = arith.mulf %40, %40 : vector<16x32xf32>
    %cst_20 = arith.constant dense<0.000000e+00> : vector<16xf32>
    %42 = vector.multi_reduction <add>, %41, %cst_20 [1] : vector<16x32xf32> to vector<16xf32>
    %43 = vector.shape_cast %42 : vector<16xf32> to vector<16x1xf32>
    %cst_21 = arith.constant 3.200000e+01 : f32
    %44 = vector.broadcast %cst_21 : f32 to vector<16x1xf32>
    %45 = arith.divf %43, %44 : vector<16x1xf32>
    %46 = vector.broadcast %38 : vector<16x1xf32> to vector<16x32xf32>
    %47 = arith.subf %34, %46 : vector<16x32xf32>
    %cst_22 = arith.constant 9.99999996E-13 : f32
    %48 = vector.broadcast %cst_22 : f32 to vector<16x1xf32>
    %49 = arith.addf %45, %48 : vector<16x1xf32>
    %50 = math.rsqrt %49 : vector<16x1xf32>
    %51 = vector.broadcast %50 : vector<16x1xf32> to vector<16x32xf32>
    %52 = arith.mulf %47, %51 : vector<16x32xf32>
    %c0_23 = arith.constant 0 : index
    %c0_24 = arith.constant 0 : index
    %53 = vector.load %arg7[%c0_23, %c0_24] : memref<1x32xf32, #tpu.memory_space<vmem>>, vector<1x32xf32>
    %54 = vector.broadcast %53 : vector<1x32xf32> to vector<16x32xf32>
    %55 = arith.mulf %52, %54 : vector<16x32xf32>
    %c0_25 = arith.constant 0 : index
    %c0_26 = arith.constant 0 : index
    %56 = vector.load %arg8[%c0_25, %c0_26] : memref<1x32xf32, #tpu.memory_space<vmem>>, vector<1x32xf32>
    %57 = vector.broadcast %56 : vector<1x32xf32> to vector<16x32xf32>
    %58 = arith.addf %55, %57 : vector<16x32xf32>
    %c0_27 = arith.constant 0 : index
    %c0_28 = arith.constant 0 : index
    %59 = vector.load %arg9[%c0_27, %c0_28] : memref<16x32xf32, #tpu.memory_space<vmem>>, vector<16x32xf32>
    tpu.vector_store %arg9[%c0_27, %c0_28], %58 {strides = array<i32>} : memref<16x32xf32, #tpu.memory_space<vmem>>, vector<16x32xf32>,
    return
  }
  func.func @transform_1(%arg0: i32, %arg1: memref<16xi32, #tpu.memory_space<smem>>) -> (i32, i32) {
    %c0_i32 = arith.constant 0 : i32
    %c0_i32_0 = arith.constant 0 : i32
    return %arg0, %c0_i32 : i32, i32
  }
  func.func @transform_2(%arg0: i32, %arg1: memref<16xi32, #tpu.memory_space<smem>>) -> (i32, i32) {
    %c0_i32 = arith.constant 0 : i32
    %c0_i32_0 = arith.constant 0 : i32
    return %arg0, %c0_i32 : i32, i32
  }
  func.func @transform_3(%arg0: i32, %arg1: memref<16xi32, #tpu.memory_space<smem>>) -> (i32, i32) {
    %c0_i32 = arith.constant 0 : i32
    %c0_i32_0 = arith.constant 0 : i32
    %c0_i32_1 = arith.constant 0 : i32
    return %c0_i32, %c0_i32_0 : i32, i32
  }
  func.func @transform_4(%arg0: i32, %arg1: memref<16xi32, #tpu.memory_space<smem>>) -> (i32, i32) {
    %c0_i32 = arith.constant 0 : i32
    %c0_i32_0 = arith.constant 0 : i32
    %c0_i32_1 = arith.constant 0 : i32
    return %c0_i32, %c0_i32_0 : i32, i32
  }
  func.func @transform_5(%arg0: i32, %arg1: memref<16xi32, #tpu.memory_space<smem>>) -> (i32, i32) {
    %c0_i32 = arith.constant 0 : i32
    %c0_i32_0 = arith.constant 0 : i32
    %c0_i32_1 = arith.constant 0 : i32
    return %c0_i32, %c0_i32_0 : i32, i32
  }
  func.func @transform_6(%arg0: i32, %arg1: memref<16xi32, #tpu.memory_space<smem>>) -> (i32, i32) {
    %c0_i32 = arith.constant 0 : i32
    %c0_i32_0 = arith.constant 0 : i32
    %c0_i32_1 = arith.constant 0 : i32
    return %c0_i32, %c0_i32_0 : i32, i32
  }
  func.func @transform_7(%arg0: i32, %arg1: memref<16xi32, #tpu.memory_space<smem>>) -> (i32, i32) {
    %c0_i32 = arith.constant 0 : i32
    %c0_i32_0 = arith.constant 0 : i32
    return %arg0, %c0_i32 : i32, i32
  }
}

</mosaic_0001>

<bundles_post_ra>
// kernel: tpu_custom_call.1
= control target key start
LH: loop header
LB: loop body
LE: loop exit
PB: predicated region body
PF: predicated region fallthrough
CT: control target
= control target key end

     0   :  { %s596_s0 = inlined_call_operand.vmem [shape: s32[16], index: 0, kind: input, shape index: {}]   ;;  %s597_s1 = inlined_call_operand.vmem [shape: f32[1536,32], index: 1, kind: input, shape index: {}]   ;;  %s598_s2 = inlined_call_operand.vmem [shape: s32[16,1], index: 2, kind: input, shape index: {}]   ;;  %s599_s3 = inlined_call_operand.vmem [shape: s32[16,1], index: 3, kind: input, shape index: {}]   ;;  %s600_s4 = inlined_call_operand.vmem [shape: f32[64,32], index: 4, kind: input, shape index: {}]   ;;  %s601_s5 = inlined_call_operand.vmem [shape: f32[2,32], index: 5, kind: input, shape index: {}]   ;;  %s602_s6 = inlined_call_operand.vmem [shape: f32[1,32], index: 6, kind: input, shape index: {}]   ;;  %s603_s7 = inlined_call_operand.vmem [shape: f32[1,32], index: 7, kind: input, shape index: {}]   ;;  %s604_s8 = inlined_call_operand.hbm [shape: f32[16,32], index: 8, kind: output, shape index: {}]  }
   0x1   :  { %s13_s29 = sshll.u32 %s596_s0, 4  ;;  %s14_s29 = int_to_ptr.vmem [resolvable:$true] %s13_s29 }
   0x2   :  { %s431_s30 = scalar_lea.vmem %s14_s29, 16  ;;  %p436_p1 = scmp.lt.s32.totalorder %s14_s29, %s14_s29 }
   0x3   :  { %p432_p0 = scmp.ne.s32.totalorder %s14_s29, %s431_s30  ;;  %p437_p2 = scmp.lt.s32.totalorder %s431_s30, %s431_s30 }
   0x5   :  { %p438_p3 = por %p437_p2, %p436_p1 }
   0x7   :  { %p439_p4 = pnand %p438_p3, %p432_p0 }
   0x9   :  { %442 = shalt.err (!%p439_p4)  }
   0xa   :  { %s485_s9 = smov [#allocation5]  }
   0xb   :  { %16 = dma.vmem_to_smem %s14_s29, 16, %s485_s9, [#allocation4] }
   0xc   :  { %471 = dma.done.wait [#allocation4], 16 }
   0xd   :  { %472 = vsyncadd [#allocation4], 4294967280 }
   0xe   :  { %18 = sfence }
   0xf   :  { %19 = vsyncpa [#allocation7], 0  ;;  %s477_s10 = smov 0  }
  0x10 LB: > { %s40_s11 = sld [smem:[#allocation5 + %s479_s10]]  ;;  %s42_s14 = scalar_lea.vmem [#allocation2], %s479_s10  ;;  %s479_s10 = sphi %s477_s10, %s38_s10  }
  0x16   : > { %s41_s13 = scalar_lea.vmem %s597_s1, %s40_s11 }
  0x17   : > { %v61_v0 = vld [vmem:[%s41_s13] sm:$0x1] }
  0x18   : > { %62 = vst [vmem:[%s42_s14] sm:$0x1] %v61_v0 }
  0x19   : > { %88 = vsyncadd [#allocation3], 16  ;;  %s38_s10 = sadd.s32 1, %s479_s10  }
  0x1a   : > { %p35_p5 = scmp.ge.s32.totalorder %s38_s10, 16  }
  0x1b   :  { %v89_v1 = vld [vmem:[%s598_s2] sm:$0xff] (%p35_p5)  ;;  %v112_v2 = vld [vmem:[%s600_s4 + $0x38] sm:$0xff] (%p35_p5)  ;;  %v486_v3 = vmov (%p35_p5), 0   ;;  %v111_v4 = vld [vmem:[%s600_s4 + $0x30] sm:$0xff] (%p35_p5)  ;;  %v487_v11 = vmov (%p35_p5), 0.0   ;;  %v91_v21 = vlaneseq (%p35_p5)  ;;  %vm113_vm4 = vcmask (%p35_p5), 523264  }
  0x1c   :  { %37 = sbr.rel (!%p35_p5) target bundleno = 16 (0x10), region = 100  ;;  %415 = vset.pattern.permute.xlu0 (%p35_p5), %v486_v3  ;;  %374 = vmatprep.subr.mxu0 (%p35_p5), %v112_v2  ;;  %v110_v5 = vld [vmem:[%s600_s4 + $0x28] sm:$0xff] (%p35_p5)  ;;  %v109_v7 = vld [vmem:[%s600_s4 + $0x20] sm:$0xff] (%p35_p5)  ;;  %v108_v10 = vld [vmem:[%s600_s4 + $0x18] sm:$0xff] (%p35_p5) }
  0x1d   :  { %94 = vperm.xlu0 (%p35_p5), %415, %v89_v1   ;;  %375 = vmatpush3.msra.mxu0 (%p35_p5), %v112_v2  ;;  %v90_v6 = vld [vmem:[%s598_s2 + $0x8] sm:$0xff] (%p35_p5)  ;;  %v195_v8 = vld [vmem:[%s599_s3] sm:$0xff] (%p35_p5)  ;;  %v107_v17 = vld [vmem:[%s600_s4 + $0x10] sm:$0xff] (%p35_p5)  ;;  %v92_v22 = vand.u32 (%p35_p5), 127, %v91_v21  ;;  %v215_v23 = vshrl.u32 (%p35_p5), %v91_v21, 7 }
  0x1e   :  { %376 = vmatprep.subr.mxu0 (%p35_p5), %v111_v4  ;;  %416 = vset.pattern.permute.xlu1 (%p35_p5), %v486_v3  ;;  %v196_v9 = vld [vmem:[%s599_s3 + $0x8] sm:$0xff] (%p35_p5)  ;;  %vm198_vm0 = vcmp.eq.s32.totalorder (%p35_p5), %v195_v8, 0  ;;  %vm222_vm2 = vcmp.eq.s32.totalorder (%p35_p5), %v195_v8, 1  ;;  %v105_v20 = vld [vmem:[%s600_s4] sm:$0xff] (%p35_p5) }
  0x1f   :  { %377 = vmatpush3.msra.mxu0 (%p35_p5), %v111_v4  ;;  %vm199_vm1 = vcmp.eq.s32.totalorder (%p35_p5), %v196_v9, 0  ;;  %vm223_vm3 = vcmp.eq.s32.totalorder (%p35_p5), %v196_v9, 1  ;;  %v357_v12 = vsel (%p35_p5), %vm198_vm0, 1.0, %v487_v11  ;;  %v359_v14 = vsel (%p35_p5), %vm222_vm2, 1.0, %v487_v11  ;;  %v106_v19 = vld [vmem:[%s600_s4 + $0x8] sm:$0xff] (%p35_p5)  ;;  %s481_s4 = smov (%p35_p5), 0  }
  0x20   :  { %378 = vmatprep.subr.mxu0 (%p35_p5), %v110_v5  ;;  %v358_v13 = vsel (%p35_p5), %vm199_vm1, 1.0, %v487_v11  ;;  %v360_v15 = vsel (%p35_p5), %vm223_vm3, 1.0, %v487_v11  ;;  %v216_v27 = vsub.s32 (%p35_p5), 0, %v215_v23  ;;  %v197_v28 = vld [vmem:[%s601_s5] sm:$0x3] (%p35_p5)  ;;  %v240_v30 = vsub.s32 (%p35_p5), 1, %v215_v23 }
  0x21   :  { %97 = vperm.xlu0 %415, %v90_v6   ;;  %379 = vmatpush3.msra.mxu0 %v110_v5  ;;  %v417_v16 = vpack.i.bf16 %v358_v13, %v357_v12  ;;  %v422_v18 = vpack.i.bf16 %v360_v15, %v359_v14 }
  0x22   :  { %380 = vmatprep.subr.mxu0 %v109_v7  ;;  %v217_v34 = vrot.slane %v197_v28, %v216_v27  ;;  %v241_v35 = vrot.slane %v197_v28, %v240_v30 }
  0x23   :  { %381 = vmatpush3.msra.mxu0 %v109_v7  ;;  %418 = vperm.xlu1 %416, %v417_v16  }
  0x24   :  { %382 = vmatprep.subr.mxu0 %v108_v10 }
  0x25   :  { %383 = vmatpush3.msra.mxu0 %v108_v10 }
  0x26   :  { %384 = vmatprep.subr.mxu0 %v107_v17 }
  0x27   :  { %385 = vmatpush3.msra.mxu0 %v107_v17  ;;  %423 = vperm.xlu1 %416, %v422_v18  }
  0x28   :  { %386 = vmatprep.subr.mxu0 %v106_v19 }
  0x29   :  { %387 = vmatpush3.msra.mxu0 %v106_v19 }
  0x2a   :  { %388 = vmatprep.subr.mxu0 %v105_v20 }
  0x2b   :  { %389 = vmatpush3.msra.mxu0 %v105_v20 }
  0x98   :  { %v95_v24 = vpop.permute.xlu0 %94 }
  0x99   :  { %vm99_vm5 = vcmp.eq.s32.totalorder %v95_v24, %v92_v22 }
  0x9a   :  { %v353_v25 = vsel %vm99_vm5, 1.0, %v487_v11 }
  0x9b   :  { %390 = vmatprep.mubr.msk.f32.mxu0 %vm113_vm4, %v353_v25 }
  0x9c   :  { %v98_v26 = vpop.permute.xlu0 %97 }
  0x9d   :  { %vm100_vm6 = vcmp.eq.s32.totalorder %v98_v26, %v92_v22 }
  0x9e   :  { %v354_v29 = vsel %vm100_vm6, 1.0, %v487_v11  ;;  %v419_v31 = vpop.permute.xlu1 %418 }
  0x9f   :  { %391 = vmatmul.mubr.msk.f32.vlgmr.msra.gmra.mxu0 %vm113_vm4, %v354_v29  ;;  %v421_v32 = vunpack.i.h.bf16 %v419_v31  ;;  %v420_v33 = vunpack.i.l.bf16 %v419_v31 }
  0xa1   :  { %v218_v37 = vmul.f32 %v420_v33, %v217_v34  ;;  %v219_v38 = vmul.f32 %v421_v32, %v217_v34 }
  0xa2   :  { %v424_v36 = vpop.permute.xlu1 %423 }
  0xa3   :  { %v426_v39 = vunpack.i.h.bf16 %v424_v36  ;;  %v425_v40 = vunpack.i.l.bf16 %v424_v36 }
  0xa5   :  { %v242_v41 = vmul.f32 %v425_v40, %v241_v35  ;;  %v243_v42 = vmul.f32 %v426_v39, %v241_v35 }
  0xa7   :  { %v244_v43 = vadd.f32 %v242_v41, %v218_v37  ;;  %v245_v44 = vadd.f32 %v243_v42, %v219_v38 }
 0x15f   :  { %v392_v45 = vpop.f32.mrf.mxu0 }
 0x161   :  { %v186_v46 = vpop.f32.mrf.mxu0 }
 0x162 LB: > { %473 = dma.done.wait [#allocation3], 16  ;;  %s483_s4 = sphi %s481_s4, %s251_s4  }
 0x163   : > { %474 = vsyncadd [#allocation3], 4294967280  ;;  %s251_s4 = sadd.s32 1, %s483_s4  }
 0x164   : > { %p248_p6 = scmp.ge.s32.totalorder %s251_s4, 16  }
 0x165   :  { %v255_v47 = vld [vmem:[#allocation2] sm:$0xff] (%p248_p6)  ;;  %v256_v48 = vld [vmem:[#allocation2 + $0x8] sm:$0xff] (%p248_p6)  ;;  %vm261_vm7 = vcmask (%p248_p6), 261120   ;;  %s488_s18 = smov (%p248_p6), [#allocation6]  }
 0x166   :  { %250 = sbr.rel (!%p248_p6) target bundleno = 354 (0x162), region = 111  ;;  %v257_v49 = vadd.f32 (%p248_p6), %v255_v47, %v186_v46  ;;  %v258_v50 = vadd.f32 (%p248_p6), %v392_v45, %v256_v48  ;;  %v361_v8 = vld [vmem:[%s602_s6] ss:$0 sm:$0xff] (%p248_p6)  ;;  %s314_s19 = sshll.u32 (%p248_p6), %s488_s18, 4  ;;  %s315_s19 = int_to_ptr.vmem [resolvable:$true] %s314_s19 }
 0x167   :  { %v362_v10 = vld [vmem:[%s603_s7] ss:$0 sm:$0xff] (%p248_p6)  ;;  %s443_s20 = scalar_lea.vmem (%p248_p6), %s315_s19, 256  ;;  %p448_p8 = scmp.lt.s32.totalorder (%p248_p6), %s315_s19, %s315_s19 }
 0x168   :  { %v259_v51 = vadd.f32 (%p248_p6), %v257_v49, %v244_v43  ;;  %v260_v52 = vadd.f32 (%p248_p6), %v258_v50, %v245_v44  ;;  %p444_p7 = scmp.ne.s32.totalorder (%p248_p6), %s315_s19, %s443_s20  ;;  %p449_p9 = scmp.lt.s32.totalorder (%p248_p6), %s443_s20, %s443_s20 }
 0x16a   :  { %v262_v53 = vsel (%p248_p6), %vm261_vm7, %v259_v51, 0.0  ;;  %v265_v54 = vsel (%p248_p6), %vm261_vm7, %v260_v52, 0.0  ;;  %p450_p10 = por (%p248_p6), %p449_p9, %p448_p8 }
 0x16b   :  { %263 = vadd.xlane.f32.xlu0 %v262_v53 }
 0x16c   :  { %p451_p11 = pnand %p450_p10, %p444_p7 }
 0x16f   :  { %266 = vadd.xlane.f32.xlu0 %v265_v54 }
 0x1f4   :  { %v264_v55 = vpop.xlane.xlu0 %263 }
 0x1f5   :  { %v269_v56 = vmul.f32 0.03125, %v264_v55 }
 0x1f7   :  { %v271_v57 = vsub.f32 %v259_v51, %v269_v56 }
 0x1f8   :  { %v267_v58 = vpop.xlane.xlu0 %266 }
 0x1f9   :  { %v270_v59 = vmul.f32 0.03125, %v267_v58  ;;  %v273_v60 = vmul.f32 %v271_v57, %v271_v57 }
 0x1fb   :  { %v272_v61 = vsub.f32 %v260_v52, %v270_v59  ;;  %v275_v62 = vsel %vm261_vm7, %v273_v60, 0.0 }
 0x1fc   :  { %276 = vadd.xlane.f32.xlu1 %v275_v62 }
 0x1fd   :  { %v274_v63 = vmul.f32 %v272_v61, %v272_v61 }
 0x1ff   :  { %v278_v0 = vsel %vm261_vm7, %v274_v63, 0.0 }
 0x200   :  { %279 = vadd.xlane.f32.xlu1 %v278_v0 }
 0x285   :  { %v277_v1 = vpop.xlane.xlu1 %276 }
 0x286   :  { %v281_v2 = vmul.f32 0.03125, %v277_v1 }
 0x288   :  { %v283_v3 = vadd.f32 1e-12, %v281_v2 }
 0x289   :  { %v280_v4 = vpop.xlane.xlu1 %279 }
 0x28a   :  { %427 = vrsqrt.f32 %v283_v3  ;;  %v282_v5 = vmul.f32 0.03125, %v280_v4 }
 0x28c   :  { %v284_v6 = vadd.f32 1e-12, %v282_v5 }
 0x28e   :  { %429 = vrsqrt.f32 %v284_v6 }
 0x297   :  { %v428_v7 = vpop.eup %427 }
 0x298   :  { %v287_v9 = vmul.f32 %v428_v7, %v271_v57 }
 0x29a   :  { %v296_v11 = vmul.f32 %v361_v8, %v287_v9 }
 0x29b   :  { %v430_v12 = vpop.eup %429 }
 0x29c   :  { %v288_v13 = vmul.f32 %v430_v12, %v272_v61  ;;  %v305_v14 = vadd.f32 %v362_v10, %v296_v11 }
 0x29e   :  { %v297_v15 = vmul.f32 %v361_v8, %v288_v13  ;;  %307 = vst.msk [vmem:[#allocation6] sm:$0xff] %vm261_vm7, %v305_v14 }
 0x2a0   :  { %v306_v16 = vadd.f32 %v362_v10, %v297_v15 }
 0x2a2   :  { %308 = vst.msk [vmem:[#allocation6 + $0x8] sm:$0xff] %vm261_vm7, %v306_v16 }
 0x2a3   :  { %454 = shalt.err (!%p451_p11)
}
 0x2a4   :  { %s489_s6 = smov 128   ;;  %s490_s7 = smov 8  }
 0x2a5   :  { %320 = dma.vmem_to_hbm [thread:$0]  %s315_s19, 256, %s604_s8, [#allocation7], %s489_s6, %s489_s6, %s490_s7  }
 0x2a6   :  { %475 = dma.done.wait [#allocation7], 256  }
 0x2a7   :  { %476 = vsyncadd [#allocation7], 4294967040 }
 0x2a8   :  { %324 = vsyncpa [#allocation7], 1 }
 0x2a9   :  { %325 = vsyncmov [#allocation3] }
 0x2ac   :  { %s326_s1 = vpop.sfrf %325 }
 0x2ad   :  { %p363_p12 = scmp.ne.s32.totalorder %s326_s1, 0 }
 0x2af   :  { %330 = shalt.err (%p363_p12)  }

</bundles_post_ra>
